<compile_context>
chip_gen: v7x
topology: tpu7x:2x2x1
jax: 0.10.0
libtpu: 0.0.40
codegen_flags: <defaults>
</compile_context>

<pallas_src>
import math
import numpy as np
import jax
import jax.numpy as jnp
from jax.experimental import pallas as pl
from jax.experimental.pallas import tpu as pltpu

EMBED_DIM = 11     # 3 position + 3 scale + 4 rotation + 1 opacity
EMBED_PAD = 16     # zero-padded K for the first MLP matmul (multiple of 8)
AUG = 8            # augmented coordinate dim: [x, y, z, 1, |p|^2, 0, 0, 0]
SENTINEL_D2 = 1e12  # |a|^2 of padded anchors -> exp(-dist) underflows to exactly 0


def _round_up(x, m):
    return ((x + m - 1) // m) * m


# --------------------------------------------------------------------------
# Kernels
# --------------------------------------------------------------------------
def _make_mlp_kernel(tile_m, n_pad, n_real, mask_needed):
    """MLP over row tiles of the (B*Np, EMBED_PAD) input.

    Rows with anchor index >= n_real (the Np padding) are zeroed in-kernel so
    the padded feature rows contribute nothing downstream, without an extra
    HBM masking pass over the feature tensor.
    """
    def _mlp_kernel(x_ref, w1_ref, b1_ref, w2_ref, b2_ref, feat_ref):
        h = jnp.dot(x_ref[...], w1_ref[...], preferred_element_type=jnp.float32)
        h = jnp.maximum(h + b1_ref[...], 0.0)
        out = jnp.dot(h.astype(w2_ref.dtype), w2_ref[...],
                      preferred_element_type=jnp.float32) + b2_ref[...]
        if mask_needed:
            rows = (pl.program_id(0) * tile_m
                    + jax.lax.broadcasted_iota(jnp.int32, (tile_m, 1), 0))
            valid = (rows % n_pad) < n_real
            out = jnp.where(valid, out, 0.0)
        feat_ref[...] = out.astype(feat_ref.dtype)
    return _mlp_kernel


def _fuse_kernel(bid_ref, xyz_ref, anct_ref, feat_ref, out_ref):
    # bid_ref : (num_tiles,) SMEM   per-tile batch id (consumed by index_maps)
    # xyz_ref : (Tv, 8)             augmented voxel coords [px,py,pz,1,|p|^2,0,0,0]
    # anct_ref: (8, Np)             augmented anchors (cols) [-2a,|a|^2,1,0,0,0]
    # feat_ref: (1, Np, H)          this tile's batch's MLP features
    # out_ref : (Tv, H)
    del bid_ref
    # squared distance on the MXU: d2 = |p|^2 + |a|^2 - 2 p.a
    d2 = jnp.dot(xyz_ref[...], anct_ref[...], preferred_element_type=jnp.float32)
    dist = jnp.sqrt(jnp.maximum(d2, 0.0))
    s = -dist
    # Stable softmax max-subtraction (one XLU reduce per tile); also guarantees
    # the sentinel-anchor exps underflow to exactly 0.
    s = s - jnp.max(s, axis=-1, keepdims=True)
    e = jnp.exp(s)                                                   # (Tv, Np) f32
    feat = feat_ref[0]                                               # (Np, H)
    # Unnormalized weight @ feature on the MXU (bf16 inputs by default,
    # f32 accumulation).
    unnorm = jnp.dot(e.astype(feat.dtype), feat,
                     preferred_element_type=jnp.float32)             # (Tv, H)
    # Deferred softmax normalization: per-row reciprocal scale (EUP slot).
    denom = jnp.sum(e, axis=-1, keepdims=True)                       # (Tv, 1) f32
    out_ref[...] = (unnorm * pl.reciprocal(denom, approx=True)).astype(out_ref.dtype)


# --------------------------------------------------------------------------
# Wrapper
# --------------------------------------------------------------------------
def occupancy_decoder_forward(gaussian_embed, voxel_coords, params, grid_shape,
                              *, tile_v=512, tile_m=512,
                              matmul_dtype=jnp.bfloat16,
                              out_dtype=jnp.float32,
                              vmem_limit_bytes=64 * 1024 * 1024):
    """JAX/Pallas equivalent of OccupancyDecoder.forward.

    grid_shape:       static (x_max, y_max, z_max) dense-grid extents.
                      # TODO(synk): the torch module derives these from
                      # voxel_coords.max().item() (a host sync); they are
                      # passed statically here to stay jittable.
    matmul_dtype:     dtype of the MXU matmul inputs (default bf16: ~2-4x MXU
                      throughput and half the resident feature VMEM on
                      v5e/v6e/v7x; accumulation stays f32).
    out_dtype:        fuse-kernel output dtype.  bf16 halves the (Nv, H) HBM
                      writeback (most useful on bandwidth-poor v5e).
    tile_v:           voxel rows per fuse grid step.  VMEM per step is roughly
                      3*Tv*Np*4B (f32 intermediates) + 2*Tv*H*4B (double-
                      buffered output) + Np*H*itemsize (resident feat slab).
                      Keep that <= ~100 MiB on v5e/v6e, <= ~48 MiB on v7x
                      (64 MiB physical VMEM per TensorCore, 2 cores).
    vmem_limit_bytes: Mosaic VMEM cap for both calls (raise above the 32 MiB
                      scoped default when Tv or N grows; halve on v7x).
    """
    x = jnp.concatenate([gaussian_embed['position'], gaussian_embed['scale'],
                         gaussian_embed['rotation'], gaussian_embed['opacity']],
                        axis=-1).astype(jnp.float32)
    B, N, E = x.shape
    assert E == EMBED_DIM
    w1, b1, w2, b2 = params
    H = w1.shape[1]
    Nv = voxel_coords.shape[0]

    # Lane-align the anchor axis (optimization: full-lane VPU/EUP/XLU work and
    # an aligned K for the e@feat matmul).
    Np = _round_up(N, 128)
    # Clamp tile_v for tiny problems; keep it a multiple of 128.
    tile_v = max(128, min(tile_v, _round_up(Nv, 128)))

    # ---- anchor grid construction (mirrors torch.linspace / meshgrid) ----
    k = int(round(float(N) ** (1.0 / 3.0)))
    assert k ** 3 == N, "N must be a perfect cube (anchor grid k^3 == N)"
    anchor_pos = jnp.linspace(-50.0, 50.0, k)
    anchor_grid = jnp.stack(
        jnp.meshgrid(anchor_pos, anchor_pos, anchor_pos, indexing='ij'),
        axis=-1).reshape(-1, 3)                                        # (N, 3)

    # mimic the torch .half() rounding, then compute in f32
    xyz = (voxel_coords[:, 1:].astype(jnp.float32)
           .astype(jnp.float16).astype(jnp.float32))                   # (Nv, 3)
    anct = anchor_grid.astype(jnp.float16).astype(jnp.float32)         # (N, 3)

    # ---- coordinate augmentation: d2 = xyz_aug @ anct_aug in ONE matmul ----
    p2 = jnp.sum(xyz * xyz, axis=-1, keepdims=True)                    # (Nv, 1)
    xyz_aug = jnp.concatenate(
        [xyz, jnp.ones_like(p2), p2, jnp.zeros((Nv, AUG - 5), jnp.float32)],
        axis=-1)                                                       # (Nv, 8)
    a2 = jnp.sum(anct * anct, axis=-1, keepdims=True)                  # (N, 1)
    anct_rows = jnp.concatenate(
        [-2.0 * anct, a2, jnp.ones_like(a2), jnp.zeros((N, AUG - 5), jnp.float32)],
        axis=-1)                                                       # (N, 8)
    if Np > N:
        # Sentinel anchors: huge |a|^2 -> exp(-dist) underflows to exactly 0.
        pad_cols = jnp.zeros((Np - N, AUG), jnp.float32)
        pad_cols = pad_cols.at[:, 3].set(SENTINEL_D2).at[:, 4].set(1.0)
        anct_rows = jnp.concatenate([anct_rows, pad_cols], axis=0)
    anct_aug = anct_rows.T                                             # (8, Np)

    # ---- MLP once for all batches; features laid out (B, Np, H) ----------
    # Pad the anchor axis BEFORE the MLP so no HBM slice/copy is needed after.
    x_p = jnp.pad(x, ((0, 0), (0, Np - N), (0, 0)))                    # (B, Np, 11)
    x_rows = x_p.reshape(B * Np, EMBED_DIM)
    x_rows = jnp.pad(x_rows, ((0, 0), (0, EMBED_PAD - EMBED_DIM)))     # K: 11 -> 16
    w1p = jnp.pad(w1.astype(jnp.float32), ((0, EMBED_PAD - EMBED_DIM), (0, 0)))

    tm = math.gcd(tile_m, B * Np)
    if tm % 8:
        tm = 128  # B*Np is always a multiple of 128

    feat = pl.pallas_call(
        _make_mlp_kernel(tm, Np, N, Np != N),
        out_shape=jax.ShapeDtypeStruct((B * Np, H), matmul_dtype),
        grid_spec=pltpu.PrefetchScalarGridSpec(
            num_scalar_prefetch=0,
            grid=(B * Np // tm,),
            in_specs=[
                pl.BlockSpec((tm, EMBED_PAD), lambda i: (i, 0)),
                pl.BlockSpec((EMBED_PAD, H), lambda i: (0, 0)),
                pl.BlockSpec((1, H), lambda i: (0, 0)),
                pl.BlockSpec((H, H), lambda i: (0, 0)),
                pl.BlockSpec((1, H), lambda i: (0, 0)),
            ],
            out_specs=pl.BlockSpec((tm, H), lambda i: (i, 0)),
        ),
        compiler_params=pltpu.CompilerParams(
            dimension_semantics=("parallel",),
            vmem_limit_bytes=vmem_limit_bytes),
    )(x_rows, w1p, b1.astype(jnp.float32), w2.astype(matmul_dtype),
      b2.astype(jnp.float32))
    feat_bnh = feat.reshape(B, Np, H)                                  # (B, Np, H)

    # ---- batch-sorted voxel layout so each Nv-tile touches ONE batch ------
    batch_ids = voxel_coords[:, 0].astype(jnp.int32)
    counts = jnp.bincount(batch_ids, length=B).astype(jnp.int32)       # (B,)
    padded_counts = ((counts + tile_v - 1) // tile_v) * tile_v
    offsets = jnp.concatenate(
        [jnp.zeros((1,), jnp.int32), jnp.cumsum(padded_counts)]).astype(jnp.int32)
    start_counts = jnp.concatenate(
        [jnp.zeros((1,), jnp.int32), jnp.cumsum(counts)[:-1]]).astype(jnp.int32)

    perm = jnp.argsort(batch_ids)                                      # group by batch
    sorted_batch = batch_ids[perm]
    within_rank = jnp.arange(Nv, dtype=jnp.int32) - start_counts[sorted_batch]
    padded_pos_sorted = offsets[sorted_batch] + within_rank
    pos = jnp.zeros((Nv,), jnp.int32).at[perm].set(padded_pos_sorted)  # row -> slot

    # Static upper bound on the padded voxel count (multiple of tile_v).
    nvp = _round_up(Nv + B * (tile_v - 1), tile_v)
    num_tiles = nvp // tile_v
    xyz_aug_padded = jnp.zeros((nvp, AUG), jnp.float32).at[pos].set(xyz_aug)

    tile_start = jnp.arange(num_tiles, dtype=jnp.int32) * tile_v
    bid = jnp.clip(jnp.searchsorted(offsets, tile_start, side='right') - 1,
                   0, B - 1).astype(jnp.int32)                         # (num_tiles,)

    # ---- main fuse kernel over batch-homogeneous Nv tiles ----------------
    feat_itemsize = jnp.dtype(matmul_dtype).itemsize
    out_itemsize = jnp.dtype(out_dtype).itemsize
    cost = pl.CostEstimate(
        flops=2 * nvp * AUG * Np + 2 * nvp * Np * H + 6 * nvp * Np,
        transcendentals=2 * nvp * Np + nvp,
        bytes_accessed=(4 * nvp * AUG + 4 * AUG * Np
                        + B * Np * H * feat_itemsize
                        + nvp * H * out_itemsize + 4 * num_tiles))

    fused_padded = pl.pallas_call(
        _fuse_kernel,
        out_shape=jax.ShapeDtypeStruct((nvp, H), out_dtype),
        grid_spec=pltpu.PrefetchScalarGridSpec(
            num_scalar_prefetch=1,                       # bid -> SMEM
            grid=(num_tiles,),
            in_specs=[
                pl.BlockSpec((tile_v, AUG), lambda i, bid: (i, 0)),   # voxel tile
                pl.BlockSpec((AUG, Np), lambda i, bid: (0, 0)),       # anchors (resident)
                pl.BlockSpec((1, Np, H), lambda i, bid: (bid[i], 0, 0)),  # own batch feat
            ],
            out_specs=pl.BlockSpec((tile_v, H), lambda i, bid: (i, 0)),
        ),
        compiler_params=pltpu.CompilerParams(
            dimension_semantics=("parallel",),           # shard Nv tiles across TCs
            vmem_limit_bytes=vmem_limit_bytes),
        cost_estimate=cost,
    )(bid, xyz_aug_padded, anct_aug, feat_bnh)

    # gather back to the original voxel order (each row already is its own batch)
    fused_rows = fused_padded[pos].astype(jnp.float32)                 # (Nv, H)

    # ---- scatter glue (data-dependent sparse -> dense; plain JAX) ----
    coords = voxel_coords[:, 1:].astype(jnp.int32)
    x_max, y_max, z_max = grid_shape
    occ = jnp.zeros((B, H, x_max, y_max, z_max), jnp.float32)
    occ = occ.at[batch_ids, :, coords[:, 0], coords[:, 1], coords[:, 2]].set(fused_rows)
    return occ


# --------------------------------------------------------------------------
# Pure-JAX reference (same math) for a correctness sanity check
# --------------------------------------------------------------------------
def _reference_forward(gaussian_embed, voxel_coords, params, grid_shape):
    x = jnp.concatenate([gaussian_embed['position'], gaussian_embed['scale'],
                         gaussian_embed['rotation'], gaussian_embed['opacity']],
                        axis=-1).astype(jnp.float32)
    B, N, _ = x.shape
    w1, b1, w2, b2 = params
    H = w1.shape[1]
    Nv = voxel_coords.shape[0]
    feat = jnp.maximum(x @ w1 + b1, 0.0) @ w2 + b2                     # (B, N, H)

    k = int(round(float(N) ** (1.0 / 3.0)))
    anchor_pos = jnp.linspace(-50.0, 50.0, k)
    anchor = jnp.stack(jnp.meshgrid(anchor_pos, anchor_pos, anchor_pos, indexing='ij'),
                       axis=-1).reshape(-1, 3)
    xyz = voxel_coords[:, 1:].astype(jnp.float32).astype(jnp.float16).astype(jnp.float32)
    anchor = anchor.astype(jnp.float16).astype(jnp.float32)
    d2 = jnp.maximum(
        jnp.sum(xyz ** 2, -1, keepdims=True) + jnp.sum(anchor ** 2, -1)[None, :]
        - 2.0 * xyz @ anchor.T, 0.0)
    w = jax.nn.softmax(-jnp.sqrt(d2), axis=-1)
    fused = jnp.einsum('vn,bnd->bvd', w, feat)

    batch_ids = voxel_coords[:, 0].astype(jnp.int32)
    coords = voxel_coords[:, 1:].astype(jnp.int32)
    x_max, y_max, z_max = grid_shape
    occ = jnp.zeros((B, H, x_max, y_max, z_max), jnp.float32)
    vals = fused[batch_ids, jnp.arange(Nv)]
    return occ.at[batch_ids, :, coords[:, 0], coords[:, 1], coords[:, 2]].set(vals)


if __name__ == "__main__":
    B, N, H, Nv = 2, 27, 128, 300   # N must be a perfect cube (3^3 anchors)
    X = Y = Z = 8                   # static dense occupancy grid extents

    key = jax.random.PRNGKey(0)
    k_pos, k_scl, k_rot, k_opa, k_w1, k_b1, k_w2, k_b2 = jax.random.split(key, 8)

    gaussian_embed = {
        'position': jax.random.normal(k_pos, (B, N, 3), jnp.float32) * 10.0,
        'scale':    jax.random.normal(k_scl, (B, N, 3), jnp.float32),
        'rotation': jax.random.normal(k_rot, (B, N, 4), jnp.float32),
        'opacity':  jax.random.normal(k_opa, (B, N, 1), jnp.float32),
    }

    # deterministic MLP parameters (Linear(11->H), Linear(H->H))
    w1 = jax.random.normal(k_w1, (EMBED_DIM, H), jnp.float32) * 0.1
    b1 = jax.random.normal(k_b1, (1, H), jnp.float32) * 0.1
    w2 = jax.random.normal(k_w2, (H, H), jnp.float32) * 0.1
    b2 = jax.random.normal(k_b2, (1, H), jnp.float32) * 0.1
    params = (w1, b1, w2, b2)

    # sparse voxel coords [batch_idx, x, y, z]; unique (b, x, y, z) tuples
    v = np.arange(Nv)
    voxel_coords = jnp.asarray(
        np.stack([v % B, v % X, (v // X) % Y, (v // (X * Y)) % Z], axis=-1),
        dtype=jnp.int32)

    occ_ref = jax.block_until_ready(
        _reference_forward(gaussian_embed, voxel_coords, params, (X, Y, Z)))

    # default path: bf16 MXU matmuls (recommended on v5e/v6e/v7x)
    occ_bf16 = jax.block_until_ready(
        occupancy_decoder_forward(gaussian_embed, voxel_coords, params, (X, Y, Z)))
    np.testing.assert_allclose(np.asarray(occ_bf16), np.asarray(occ_ref),
                               rtol=3e-2, atol=3e-2)

    # f32 matmul path (tighter tolerance)
    occ_f32 = jax.block_until_ready(
        occupancy_decoder_forward(gaussian_embed, voxel_coords, params, (X, Y, Z),
                                  matmul_dtype=jnp.float32))
    np.testing.assert_allclose(np.asarray(occ_f32), np.asarray(occ_ref),
                               rtol=5e-3, atol=5e-3)

    print("KERNEL_OK")
</pallas_src>

<mosaic_0001>
module attributes {stable_mosaic.version = 11 : i64} {
  func.func @_mlp_kernel(%arg0: i32, %arg1: memref<256x16xf32, #tpu.memory_space<vmem>>, %arg2: memref<16x128xf32, #tpu.memory_space<vmem>>, %arg3: memref<1x128xf32, #tpu.memory_space<vmem>>, %arg4: memref<128x128xbf16, #tpu.memory_space<vmem>>, %arg5: memref<1x128xf32, #tpu.memory_space<vmem>>, %arg6: memref<256x128xbf16, #tpu.memory_space<vmem>>) attributes {dimension_semantics = [#tpu.dimension_semantics<parallel>], iteration_bounds = array<i64: 1>, scalar_prefetch = 0 : i64, scratch_operands = 0 : i64, tpu.core_type = #tpu.core_type<tc>, window_params = [{transform_indices = @transform_0, window_bounds = array<i64: 256, 16>}, {pipeline_mode = #tpu.pipeline_mode<synchronous>, transform_indices = @transform_1, window_bounds = array<i64: 16, 128>}, {pipeline_mode = #tpu.pipeline_mode<synchronous>, transform_indices = @transform_2, window_bounds = array<i64: 1, 128>}, {pipeline_mode = #tpu.pipeline_mode<synchronous>, transform_indices = @transform_3, window_bounds = array<i64: 128, 128>}, {pipeline_mode = #tpu.pipeline_mode<synchronous>, transform_indices = @transform_4, window_bounds = array<i64: 1, 128>}, {transform_indices = @transform_5, window_bounds = array<i64: 256, 128>}]} {
    %c0 = arith.constant 0 : index
    %c0_0 = arith.constant 0 : index
    %0 = vector.load %arg1[%c0, %c0_0] : memref<256x16xf32, #tpu.memory_space<vmem>>, vector<256x16xf32>
    %c0_1 = arith.constant 0 : index
    %c0_2 = arith.constant 0 : index
    %1 = vector.load %arg2[%c0_1, %c0_2] : memref<16x128xf32, #tpu.memory_space<vmem>>, vector<16x128xf32>
    %cst = arith.constant dense<0.000000e+00> : vector<256x128xf32>
    %2 = tpu.matmul %0, %1, %cst {dimension_numbers = #tpu.dot_dimension_numbers<[1], [0], [0], [1], [0, 0, 1, 1], [], []>} : vector<256x16xf32>, vector<16x128xf32>, vector<256x128xf32> -> vector<256x128xf32>
    %c0_3 = arith.constant 0 : index
    %c0_4 = arith.constant 0 : index
    %3 = vector.load %arg3[%c0_3, %c0_4] : memref<1x128xf32, #tpu.memory_space<vmem>>, vector<1x128xf32>
    %4 = vector.broadcast %3 : vector<1x128xf32> to vector<256x128xf32>
    %5 = arith.addf %2, %4 : vector<256x128xf32>
    %cst_5 = arith.constant 0.000000e+00 : f32
    %6 = vector.broadcast %cst_5 : f32 to vector<256x128xf32>
    %7 = arith.maximumf %5, %6 : vector<256x128xf32>
    %8 = arith.truncf %7 : vector<256x128xf32> to vector<256x128xbf16>
    %c0_6 = arith.constant 0 : index
    %c0_7 = arith.constant 0 : index
    %9 = vector.load %arg4[%c0_6, %c0_7] : memref<128x128xbf16, #tpu.memory_space<vmem>>, vector<128x128xbf16>
    %cst_8 = arith.constant dense<0.000000e+00> : vector<256x128xf32>
    %10 = tpu.matmul %8, %9, %cst_8 {dimension_numbers = #tpu.dot_dimension_numbers<[1], [0], [0], [1], [0, 0, 1, 1], [], []>} : vector<256x128xbf16>, vector<128x128xbf16>, vector<256x128xf32> -> vector<256x128xf32>
    %c0_9 = arith.constant 0 : index
    %c0_10 = arith.constant 0 : index
    %11 = vector.load %arg5[%c0_9, %c0_10] : memref<1x128xf32, #tpu.memory_space<vmem>>, vector<1x128xf32>
    %12 = vector.broadcast %11 : vector<1x128xf32> to vector<256x128xf32>
    %13 = arith.addf %10, %12 : vector<256x128xf32>
    %c256_i32 = arith.constant 256 : i32
    %14 = arith.muli %arg0, %c256_i32 : i32
    %15 = tpu.iota {dimensions = array<i32: 0>} : vector<256x1xi32>
    %16 = vector.broadcast %14 : i32 to vector<256x1xi32>
    %17 = arith.addi %16, %15 : vector<256x1xi32>
    %c128_i32 = arith.constant 128 : i32
    %c0_i32 = arith.constant 0 : i32
    %18 = arith.cmpi eq, %c128_i32, %c0_i32 : i32
    %c1_i32 = arith.constant 1 : i32
    %19 = arith.select %18, %c1_i32, %c128_i32 : i32
    %20 = vector.broadcast %19 : i32 to vector<256x1xi32>
    %21 = arith.remsi %17, %20 : vector<256x1xi32>
    %c0_i32_11 = arith.constant 0 : i32
    %22 = vector.broadcast %c0_i32_11 : i32 to vector<256x1xi32>
    %23 = arith.cmpi ne, %21, %22 : vector<256x1xi32>
    %c0_i32_12 = arith.constant 0 : i32
    %24 = vector.broadcast %c0_i32_12 : i32 to vector<256x1xi32>
    %25 = arith.cmpi slt, %21, %24 : vector<256x1xi32>
    %c0_i32_13 = arith.constant 0 : i32
    %26 = arith.cmpi slt, %19, %c0_i32_13 : i32
    %27 = vector.broadcast %26 : i1 to vector<256x1xi1>
    %28 = vector.broadcast %27 : vector<256x1xi1> to vector<256x1xi1>
    %29 = arith.xori %25, %28 : vector<256x1xi1>
    %30 = arith.andi %29, %23 : vector<256x1xi1>
    %31 = vector.broadcast %19 : i32 to vector<256x1xi32>
    %32 = arith.addi %21, %31 : vector<256x1xi32>
    %33 = arith.select %30, %32, %21 : vector<256x1xi1>, vector<256x1xi32>
    %c27_i32 = arith.constant 27 : i32
    %34 = vector.broadcast %c27_i32 : i32 to vector<256x1xi32>
    %35 = arith.cmpi slt, %33, %34 : vector<256x1xi32>
    %cst_14 = arith.constant 0.000000e+00 : f32
    %36 = vector.shape_cast %35 : vector<256x1xi1> to vector<256x1xi1>
    %37 = vector.broadcast %36 : vector<256x1xi1> to vector<256x128xi1>
    %38 = vector.broadcast %cst_14 : f32 to vector<256x128xf32>
    %39 = arith.select %37, %13, %38 : vector<256x128xi1>, vector<256x128xf32>
    %40 = arith.truncf %39 : vector<256x128xf32> to vector<256x128xbf16>
    %c0_15 = arith.constant 0 : index
    %c0_16 = arith.constant 0 : index
    %41 = vector.load %arg6[%c0_15, %c0_16] : memref<256x128xbf16, #tpu.memory_space<vmem>>, vector<256x128xbf16>
    tpu.vector_store %arg6[%c0_15, %c0_16], %40 {strides = array<i32>} : memref<256x128xbf16, #tpu.memory_space<vmem>>, vector<256x128xbf16>,
    return
  }
  func.func @transform_0(%arg0: i32) -> (i32, i32) {
    %c0_i32 = arith.constant 0 : i32
    %c0_i32_0 = arith.constant 0 : i32
    return %arg0, %c0_i32 : i32, i32
  }
  func.func @transform_1(%arg0: i32) -> (i32, i32) {
    %c0_i32 = arith.constant 0 : i32
    %c0_i32_0 = arith.constant 0 : i32
    %c0_i32_1 = arith.constant 0 : i32
    return %c0_i32, %c0_i32_0 : i32, i32
  }
  func.func @transform_2(%arg0: i32) -> (i32, i32) {
    %c0_i32 = arith.constant 0 : i32
    %c0_i32_0 = arith.constant 0 : i32
    %c0_i32_1 = arith.constant 0 : i32
    return %c0_i32, %c0_i32_0 : i32, i32
  }
  func.func @transform_3(%arg0: i32) -> (i32, i32) {
    %c0_i32 = arith.constant 0 : i32
    %c0_i32_0 = arith.constant 0 : i32
    %c0_i32_1 = arith.constant 0 : i32
    return %c0_i32, %c0_i32_0 : i32, i32
  }
  func.func @transform_4(%arg0: i32) -> (i32, i32) {
    %c0_i32 = arith.constant 0 : i32
    %c0_i32_0 = arith.constant 0 : i32
    %c0_i32_1 = arith.constant 0 : i32
    return %c0_i32, %c0_i32_0 : i32, i32
  }
  func.func @transform_5(%arg0: i32) -> (i32, i32) {
    %c0_i32 = arith.constant 0 : i32
    %c0_i32_0 = arith.constant 0 : i32
    return %arg0, %c0_i32 : i32, i32
  }
}

</mosaic_0001>

<bundles_post_ra>
// kernel: tpu_custom_call.1
= control target key start
LH: loop header
LB: loop body
LE: loop exit
PB: predicated region body
PF: predicated region fallthrough
CT: control target
= control target key end

     0   :  { %10 = vsyncpa [#allocation3], 0  ;;  %s2127_s0 = inlined_call_operand.hbm [shape: f32[256,16], index: 0, kind: input, shape index: {}]   ;;  %s2128_s1 = inlined_call_operand.hbm [shape: f32[16,128], index: 1, kind: input, shape index: {}]   ;;  %s2129_s2 = inlined_call_operand.hbm [shape: f32[1,128], index: 2, kind: input, shape index: {}]   ;;  %s2130_s3 = inlined_call_operand.hbm [shape: bf16[128,128], index: 3, kind: input, shape index: {}]   ;;  %s2131_s4 = inlined_call_operand.hbm [shape: f32[1,128], index: 4, kind: input, shape index: {}]   ;;  %s2132_s5 = inlined_call_operand.hbm [shape: bf16[256,128], index: 5, kind: output, shape index: {}]  }
   0x1   :  { %11 = vsyncpa [#allocation6], 0 }
   0x2   :  { %12 = vsyncpa [#allocation9], 0 }
   0x3   :  { %13 = vsyncpa [#allocation4], 0  ;;  %s1929_s18 = smov [#allocation5]   ;;  %s1930_s20 = smov [#allocation8]  }
   0x4   :  { %s31_s19 = sshll.u32 %s1929_s18, 4  ;;  %s53_s21 = sshll.u32 %s1930_s20, 4  ;;  %s32_s19 = int_to_ptr.vmem [resolvable:$true] %s31_s19  ;;  %s1970_s21 = int_to_ptr.vmem [resolvable:$true] %s53_s21 }
   0x5   :  { %s1789_s24 = scalar_lea.hbm %s2128_s1, 256 }
   0x6   :  { %p1790_p0 = scmp.ne.s32.totalorder %s2128_s1, %s1789_s24  ;;  %p1793_p1 = scmp.lt.u32.totalorder %s1789_s24, %s2128_s1 }
   0x8   :  { %p1795_p2 = pnand %p1793_p1, %p1790_p0 }
   0xa   :  { %1798 = shalt.err (!%p1795_p2)
}
   0xb   :  { %s1799_s29 = scalar_lea.vmem %s32_s19, 256  ;;  %p1804_p4 = scmp.lt.s32.totalorder %s32_s19, %s32_s19 }
   0xc   :  { %p1800_p3 = scmp.ne.s32.totalorder %s32_s19, %s1799_s29  ;;  %p1805_p5 = scmp.lt.s32.totalorder %s1799_s29, %s1799_s29 }
   0xe   :  { %p1806_p6 = por %p1805_p5, %p1804_p4 }
  0x10   :  { %p1807_p7 = pnand %p1806_p6, %p1800_p3 }
  0x12   :  { %1810 = shalt.err (!%p1807_p7)
}
  0x13   :  { %s1931_s30 = smov 128   ;;  %s1932_s6 = smov 8  }
  0x14   :  { %37 = dma.hbm_to_vmem [thread:$0]  %s2128_s1, 256, %s32_s19, [#allocation6], %s1931_s30, %s1931_s30, %s1932_s6  }
  0x15   :  { %s1811_s11 = scalar_lea.hbm %s2130_s3, 1024 }
  0x16   :  { %p1812_p8 = scmp.ne.s32.totalorder %s2130_s3, %s1811_s11  ;;  %p1815_p9 = scmp.lt.u32.totalorder %s1811_s11, %s2130_s3 }
  0x18   :  { %p1817_p10 = pnand %p1815_p9, %p1812_p8 }
  0x1a   :  { %1820 = shalt.err (!%p1817_p10)
}
  0x1b   :  { %s1821_s16 = scalar_lea.vmem %s1970_s21, 1024  ;;  %p1826_p12 = scmp.lt.s32.totalorder %s1970_s21, %s1970_s21 }
  0x1c   :  { %p1822_p11 = scmp.ne.s32.totalorder %s1970_s21, %s1821_s16  ;;  %p1827_p13 = scmp.lt.s32.totalorder %s1821_s16, %s1821_s16 }
  0x1e   :  { %p1828_p0 = por %p1827_p13, %p1826_p12 }
  0x20   :  { %p1829_p1 = pnand %p1828_p0, %p1822_p11 }
  0x22   :  { %1832 = shalt.err (!%p1829_p1)
}
  0x23   :  { %s1933_s1 = smov 64   ;;  %s1934_s17 = smov 4  }
  0x24   :  { %59 = dma.hbm_to_vmem [thread:$0]  %s2130_s3, 1024, %s1970_s21, [#allocation9], %s1933_s1, %s1933_s1, %s1934_s17  }
  0x25   :  { %s1935_s20 = smov [#allocation2]   ;;  %s1936_s23 = smov [#allocation7]  }
  0x26   :  { %s19_s22 = sshll.u32 %s1935_s20, 4  ;;  %s44_s24 = sshll.u32 %s1936_s23, 4  ;;  %s20_s22 = int_to_ptr.vmem [resolvable:$true] %s19_s22  ;;  %s45_s24 = int_to_ptr.vmem [resolvable:$true] %s44_s24 }
  0x27   :  { %s1833_s27 = scalar_lea.hbm %s2127_s0, 4096 }
  0x28   :  { %p1834_p2 = scmp.ne.s32.totalorder %s2127_s0, %s1833_s27  ;;  %p1837_p3 = scmp.lt.u32.totalorder %s1833_s27, %s2127_s0 }
  0x2a   :  { %p1839_p4 = pnand %p1837_p3, %p1834_p2 }
  0x2c   :  { %1842 = shalt.err (!%p1839_p4)
}
  0x2d   :  { %s1843_s3 = scalar_lea.vmem %s20_s22, 4096  ;;  %p1848_p6 = scmp.lt.s32.totalorder %s20_s22, %s20_s22 }
  0x2e   :  { %p1844_p5 = scmp.ne.s32.totalorder %s20_s22, %s1843_s3  ;;  %p1849_p7 = scmp.lt.s32.totalorder %s1843_s3, %s1843_s3 }
  0x30   :  { %p1850_p8 = por %p1849_p7, %p1848_p6 }
  0x32   :  { %p1851_p9 = pnand %p1850_p8, %p1844_p5 }
  0x34   :  { %1854 = shalt.err (!%p1851_p9)
}
  0x35   :  { %25 = dma.hbm_to_vmem [thread:$0]  %s2127_s0, 4096, %s20_s22, [#allocation3], %s1931_s30, %s1931_s30, %s1932_s6  }
  0x36   :  { %s1855_s12 = scalar_lea.hbm %s2129_s2, 16 }
  0x37   :  { %p1856_p10 = scmp.ne.s32.totalorder %s2129_s2, %s1855_s12  ;;  %p1859_p11 = scmp.lt.u32.totalorder %s1855_s12, %s2129_s2 }
  0x39   :  { %p1861_p12 = pnand %p1859_p11, %p1856_p10 }
  0x3b   :  { %1864 = shalt.err (!%p1861_p12)
}
  0x3c   :  { %s1865_s18 = scalar_lea.vmem %s45_s24, 16  ;;  %s1869_s19 = scalar_lea.vmem %s45_s24, 32 }
  0x3d   :  { %p1866_p13 = scmp.ne.s32.totalorder %s45_s24, %s1865_s18  ;;  %p1870_p0 = scmp.lt.s32.totalorder %s45_s24, %s45_s24 }
  0x3e   :  { %p1871_p1 = scmp.lt.s32.totalorder %s1869_s19, %s1865_s18 }
  0x40   :  { %p1872_p2 = por %p1871_p1, %p1870_p0 }
  0x42   :  { %p1873_p3 = pnand %p1872_p2, %p1866_p13 }
  0x44   :  { %1876 = shalt.err (!%p1873_p3)
}
  0x45   :  { %47 = dma.hbm_to_vmem [thread:$0]  %s2129_s2, 16, %s45_s24, [#allocation6]  }
  0x46   :  { %s1937_s6 = smov [#allocation10]   ;;  %s1877_s25 = scalar_lea.hbm %s2131_s4, 16 }
  0x47   :  { %s66_s20 = sshll.u32 %s1937_s6, 4  ;;  %p1878_p4 = scmp.ne.s32.totalorder %s2131_s4, %s1877_s25  ;;  %s67_s20 = int_to_ptr.vmem [resolvable:$true] %s66_s20 }
  0x48   :  { %p1881_p5 = scmp.lt.u32.totalorder %s1877_s25, %s2131_s4 }
  0x4a   :  { %p1883_p6 = pnand %p1881_p5, %p1878_p4 }
  0x4c   :  { %1886 = shalt.err (!%p1883_p6)
}
  0x4d   :  { %s1887_s7 = scalar_lea.vmem %s67_s20, 16  ;;  %s1891_s2 = scalar_lea.vmem %s67_s20, 32 }
  0x4e   :  { %p1888_p7 = scmp.ne.s32.totalorder %s67_s20, %s1887_s7  ;;  %p1892_p8 = scmp.lt.s32.totalorder %s67_s20, %s67_s20 }
  0x4f   :  { %p1893_p9 = scmp.lt.s32.totalorder %s1891_s2, %s1887_s7 }
  0x51   :  { %p1894_p10 = por %p1893_p9, %p1892_p8 }
  0x53   :  { %p1895_p11 = pnand %p1894_p10, %p1888_p7 }
  0x55   :  { %1898 = shalt.err (!%p1895_p11)
}
  0x56   :  { %69 = dma.hbm_to_vmem [thread:$0]  %s2131_s4, 16, %s67_s20, [#allocation9]  }
  0x57   :  { %1921 = dma.done.wait [#allocation3], 4096  }
  0x58   :  { %1922 = vsyncadd [#allocation3], 4294963200 }
  0x59   :  { %1923 = dma.done.wait [#allocation6], 272  }
  0x5a   :  { %1924 = vsyncadd [#allocation6], 4294967024 }
  0x5b   :  { %1925 = dma.done.wait [#allocation9], 1040  }
  0x5c   :  { %1926 = vsyncadd [#allocation9], 4294966256  ;;  %vm127_vm0 = vcmask 130048   ;;  %v118_v0 = vld [vmem:[#allocation5] sm:$0xff]  ;;  %v119_v1 = vld [vmem:[#allocation5 + $0x8] sm:$0xff]  ;;  %s1939_s4 = smov [#allocation11]  }
  0x5d   :  { %v86_v2 = vld [vmem:[#allocation2] sm:$0xff]  ;;  %v1750_v3 = vpack.c.bf16 %v119_v1, %v118_v0  ;;  %v87_v4 = vld [vmem:[#allocation2 + $0x8] sm:$0xff]  ;;  %v88_v5 = vld [vmem:[#allocation2 + $0x10] sm:$0xff]  ;;  %s1473_s3 = sshll.u32 %s1939_s4, 4  ;;  %s1474_s3 = int_to_ptr.vmem [resolvable:$true] %s1473_s3 }
  0x5e   :  { %1654 = vmatprep.mubr.msk.f32.mxu0 %vm127_vm0, %v86_v2  ;;  %v89_v6 = vld [vmem:[#allocation2 + $0x18] sm:$0xff]  ;;  %v90_v7 = vld [vmem:[#allocation2 + $0x20] sm:$0xff]  ;;  %v91_v8 = vld [vmem:[#allocation2 + $0x28] sm:$0xff]  ;;  %s1899_s21 = scalar_lea.vmem %s1474_s3, 2048  ;;  %p1904_p13 = scmp.lt.s32.totalorder %s1474_s3, %s1474_s3 }
  0x5f   :  { %1751 = vmatprep.subr.bf16.mxu0 %v1750_v3  ;;  %v92_v9 = vld [vmem:[#allocation2 + $0x30] sm:$0xff]  ;;  %v1782_v11 = vld [vmem:[#allocation8 + $0x8] sm:$0xff]   ;;  %v1783_v14 = vld [vmem:[#allocation8 + $0x10] sm:$0xff]   ;;  %p1900_p12 = scmp.ne.s32.totalorder %s1474_s3, %s1899_s21  ;;  %p1905_p0 = scmp.lt.s32.totalorder %s1899_s21, %s1899_s21 }
  0x60   :  { %1753 = vmatpush3.bf16.msra.mxu0 %v1750_v3  ;;  %v1781_v10 = vld [vmem:[#allocation8] sm:$0xff]   ;;  %v94_v13 = vld [vmem:[#allocation2 + $0x40] sm:$0xff]  ;;  %v95_v15 = vld [vmem:[#allocation2 + $0x48] sm:$0xff] }
  0x61   :  { %v93_v12 = vld [vmem:[#allocation2 + $0x38] sm:$0xff]  ;;  %1702 = vmatprep.subr.bf16.mxu0 %v1781_v10  ;;  %1754 = vmatprep.subr.bf16.mxu1 %v1781_v10  ;;  %v96_v16 = vld [vmem:[#allocation2 + $0x50] sm:$0xff]  ;;  %v98_v19 = vld [vmem:[#allocation2 + $0x60] sm:$0xff]  ;;  %p1906_p1 = por %p1905_p0, %p1904_p13 }
  0x62   :  { %1762 = vmatpush3.bf16.msra.mxu1 %v1781_v10  ;;  %v1784_v17 = vld [vmem:[#allocation8 + $0x18] sm:$0xff]   ;;  %v97_v18 = vld [vmem:[#allocation2 + $0x58] sm:$0xff]  ;;  %v102_v24 = vld [vmem:[#allocation2 + $0x80] sm:$0xff] }
  0x63   :  { %1655 = vmatmul.mubr.msk.f32.vlgmr.msra.gmra.mrb[0].mxu0 %vm127_vm0, %v87_v4  ;;  %1755 = vmatprep.subr.bf16.mxu1 %v1782_v11  ;;  %v1785_v20 = vld [vmem:[#allocation8 + $0x20] sm:$0xff]   ;;  %v99_v21 = vld [vmem:[#allocation2 + $0x68] sm:$0xff]  ;;  %v106_v28 = vld [vmem:[#allocation2 + $0xa0] sm:$0xff]  ;;  %p1907_p2 = pnand %p1906_p1, %p1900_p12 }
  0x64   :  { %1657 = vmatprep.mubr.msk.f32.mxu0 %vm127_vm0, %v88_v5  ;;  %1703 = vmatpush3.bf16.msra.mxu0 %v1781_v10  ;;  %v100_v22 = vld [vmem:[#allocation2 + $0x70] sm:$0xff]  ;;  %v101_v23 = vld [vmem:[#allocation2 + $0x78] sm:$0xff]  ;;  %v103_v25 = vld [vmem:[#allocation2 + $0x88] sm:$0xff] }
  0x65   :  { %1704 = vmatprep.subr.bf16.mxu0 %v1782_v11  ;;  %v104_v26 = vld [vmem:[#allocation2 + $0x90] sm:$0xff]  ;;  %v105_v27 = vld [vmem:[#allocation2 + $0x98] sm:$0xff]  ;;  %v107_v29 = vld [vmem:[#allocation2 + $0xa8] sm:$0xff] }
  0x66   :  { %1763 = vmatpush3.bf16.msra.mxu1 %v1782_v11  ;;  %v108_v30 = vld [vmem:[#allocation2 + $0xb0] sm:$0xff]  ;;  %v109_v31 = vld [vmem:[#allocation2 + $0xb8] sm:$0xff]  ;;  %v110_v32 = vld [vmem:[#allocation2 + $0xc0] sm:$0xff] }
  0x67   :  { %1658 = vmatmul.mubr.msk.f32.gmra.mrb[2].mxu0 %vm127_vm0, %v89_v6  ;;  %1756 = vmatprep.subr.bf16.mxu1 %v1783_v14  ;;  %v111_v33 = vld [vmem:[#allocation2 + $0xc8] sm:$0xff]  ;;  %v112_v34 = vld [vmem:[#allocation2 + $0xd0] sm:$0xff]  ;;  %v113_v35 = vld [vmem:[#allocation2 + $0xd8] sm:$0xff] }
  0x68   :  { %1660 = vmatprep.mubr.msk.f32.mxu0 %vm127_vm0, %v90_v7  ;;  %1705 = vmatpush3.bf16.msra.mxu0 %v1782_v11  ;;  %v114_v36 = vld [vmem:[#allocation2 + $0xe0] sm:$0xff]  ;;  %v115_v37 = vld [vmem:[#allocation2 + $0xe8] sm:$0xff]  ;;  %v116_v38 = vld [vmem:[#allocation2 + $0xf0] sm:$0xff] }
  0x69   :  { %1706 = vmatprep.subr.bf16.mxu0 %v1783_v14  ;;  %v117_v39 = vld [vmem:[#allocation2 + $0xf8] sm:$0xff]  ;;  %v1787_v41 = vld [vmem:[#allocation8 + $0x30] sm:$0xff]   ;;  %v1788_v42 = vld [vmem:[#allocation8 + $0x38] sm:$0xff]  }
  0x6a   :  { %1764 = vmatpush3.bf16.msra.mxu1 %v1783_v14  ;;  %v1786_v40 = vld [vmem:[#allocation8 + $0x28] sm:$0xff]   ;;  %v2078_v43 = vld [vmem:[#allocation7] ss:$0 sm:$0xff] }
  0x6b   :  { %1661 = vmatmul.mubr.msk.f32.gmra.mrb[4].mxu0 %vm127_vm0, %v91_v8  ;;  %1757 = vmatprep.subr.bf16.mxu1 %v1784_v17 }
  0x6c   :  { %1663 = vmatprep.mubr.msk.f32.mxu0 %vm127_vm0, %v92_v9  ;;  %1707 = vmatpush3.bf16.msra.mxu0 %v1783_v14 }
  0x6d   :  { %1708 = vmatprep.subr.bf16.mxu0 %v1784_v17 }
  0x6e   :  { %1765 = vmatpush3.bf16.msra.mxu1 %v1784_v17 }
  0x6f   :  { %1664 = vmatmul.mubr.msk.f32.gmra.mrb[6].mxu0 %vm127_vm0, %v93_v12  ;;  %1758 = vmatprep.subr.bf16.mxu1 %v1785_v20 }
  0x70   :  { %1666 = vmatprep.mubr.msk.f32.mxu0 %vm127_vm0, %v94_v13  ;;  %1709 = vmatpush3.bf16.msra.mxu0 %v1784_v17 }
  0x71   :  { %1710 = vmatprep.subr.bf16.mxu0 %v1785_v20 }
  0x72   :  { %1766 = vmatpush3.bf16.msra.mxu1 %v1785_v20 }
  0x73   :  { %1667 = vmatmul.mubr.msk.f32.gmra.mrb[8].mxu0 %vm127_vm0, %v95_v15  ;;  %1759 = vmatprep.subr.bf16.mxu1 %v1786_v40 }
  0x74   :  { %1669 = vmatprep.mubr.msk.f32.mxu0 %vm127_vm0, %v96_v16  ;;  %1711 = vmatpush3.bf16.msra.mxu0 %v1785_v20 }
  0x75   :  { %1712 = vmatprep.subr.bf16.mxu0 %v1786_v40 }
  0x76   :  { %1767 = vmatpush3.bf16.msra.mxu1 %v1786_v40 }
  0x77   :  { %1670 = vmatmul.mubr.msk.f32.gmra.mrb[10].mxu0 %vm127_vm0, %v97_v18  ;;  %1760 = vmatprep.subr.bf16.mxu1 %v1787_v41 }
  0x78   :  { %1672 = vmatprep.mubr.msk.f32.mxu0 %vm127_vm0, %v98_v19  ;;  %1713 = vmatpush3.bf16.msra.mxu0 %v1786_v40 }
  0x79   :  { %1714 = vmatprep.subr.bf16.mxu0 %v1787_v41 }
  0x7a   :  { %1768 = vmatpush3.bf16.msra.mxu1 %v1787_v41 }
  0x7b   :  { %1673 = vmatmul.mubr.msk.f32.gmra.mrb[12].mxu0 %vm127_vm0, %v99_v21  ;;  %1761 = vmatprep.subr.bf16.mxu1 %v1788_v42 }
  0x7c   :  { %1675 = vmatprep.mubr.msk.f32.mxu0 %vm127_vm0, %v100_v22  ;;  %1715 = vmatpush3.bf16.msra.mxu0 %v1787_v41 }
  0x7d   :  { %1716 = vmatprep.subr.bf16.mxu0 %v1788_v42 }
  0x7e   :  { %1769 = vmatpush3.bf16.msra.mxu1 %v1788_v42 }
  0x7f   :  { %1676 = vmatmul.mubr.msk.f32.gmra.mrb[14].mxu0 %vm127_vm0, %v101_v23 }
  0x80   :  { %1678 = vmatprep.mubr.msk.f32.mxu0 %vm127_vm0, %v102_v24  ;;  %1717 = vmatpush3.bf16.msra.mxu0 %v1788_v42 }
  0x83   :  { %1679 = vmatmul.mubr.msk.f32.gmra.mrb[16].mxu0 %vm127_vm0, %v103_v25 }
  0x84   :  { %1681 = vmatprep.mubr.msk.f32.mxu0 %vm127_vm0, %v104_v26 }
  0x87   :  { %1682 = vmatmul.mubr.msk.f32.gmra.mrb[18].mxu0 %vm127_vm0, %v105_v27 }
  0x88   :  { %1684 = vmatprep.mubr.msk.f32.mxu0 %vm127_vm0, %v106_v28 }
  0x8b   :  { %1685 = vmatmul.mubr.msk.f32.gmra.mrb[20].mxu0 %vm127_vm0, %v107_v29 }
  0x8c   :  { %1687 = vmatprep.mubr.msk.f32.mxu0 %vm127_vm0, %v108_v30 }
  0x8f   :  { %1688 = vmatmul.mubr.msk.f32.gmra.mrb[22].mxu0 %vm127_vm0, %v109_v31 }
  0x90   :  { %1690 = vmatprep.mubr.msk.f32.mxu0 %vm127_vm0, %v110_v32 }
  0x93   :  { %1691 = vmatmul.mubr.msk.f32.gmra.mrb[24].mxu0 %vm127_vm0, %v111_v33 }
  0x94   :  { %1693 = vmatprep.mubr.msk.f32.mxu0 %vm127_vm0, %v112_v34 }
  0x97   :  { %1694 = vmatmul.mubr.msk.f32.gmra.mrb[26].mxu0 %vm127_vm0, %v113_v35 }
  0x98   :  { %1696 = vmatprep.mubr.msk.f32.mxu0 %vm127_vm0, %v114_v36 }
  0x9b   :  { %1697 = vmatmul.mubr.msk.f32.gmra.mrb[28].mxu0 %vm127_vm0, %v115_v37 }
  0x9c   :  { %1699 = vmatprep.mubr.msk.f32.mxu0 %vm127_vm0, %v116_v38 }
  0x9f   :  { %1700 = vmatmul.mubr.msk.f32.gmra.mrb[30].mxu0 %vm127_vm0, %v117_v39 }
 0x136   :  { %v1656_v44 = vpop.f32.mrb[0].mxu0 }
 0x137   :  { %v296_v45 = vadd.f32 %v1656_v44, %v2078_v43  ;;  %v290_v46 = vpop.f32.mrb[1].mxu0 }
 0x138   :  { %v291_v47 = vadd.f32 %v2078_v43, %v290_v46 }
 0x139   :  { %v450_v48 = vmax.f32 %v296_v45, 0.0 }
 0x13a   :  { %v449_v49 = vmax.f32 %v291_v47, 0.0  ;;  %v1659_v50 = vpop.f32.mrb[2].mxu0 }
 0x13b   :  { %v306_v51 = vadd.f32 %v1659_v50, %v2078_v43  ;;  %v300_v52 = vpop.f32.mrb[3].mxu0 }
 0x13c   :  { %v481_v53 = vpack.c.bf16 %v450_v48, %v449_v49  ;;  %v301_v54 = vadd.f32 %v2078_v43, %v300_v52 }
 0x13d   :  { %v452_v55 = vmax.f32 %v306_v51, 0.0 }
 0x13e   :  { %v451_v56 = vmax.f32 %v301_v54, 0.0  ;;  %v1662_v57 = vpop.f32.mrb[4].mxu0  ;;  %1718 = vmatprep.mubr.bf16.mxu0 %v481_v53 }
 0x13f   :  { %v316_v58 = vadd.f32 %v1662_v57, %v2078_v43  ;;  %v310_v59 = vpop.f32.mrb[5].mxu0 }
 0x140   :  { %v482_v60 = vpack.c.bf16 %v452_v55, %v451_v56  ;;  %v311_v61 = vadd.f32 %v2078_v43, %v310_v59 }
 0x141   :  { %v454_v62 = vmax.f32 %v316_v58, 0.0 }
 0x142   :  { %v453_v63 = vmax.f32 %v311_v61, 0.0  ;;  %v1665_v0 = vpop.f32.mrb[6].mxu0  ;;  %1719 = vmatmul.mubr.bf16.vlgmr.msra.gmra.mrb[32].mxu0 %v482_v60 }
 0x143   :  { %v326_v1 = vadd.f32 %v1665_v0, %v2078_v43  ;;  %v320_v2 = vpop.f32.mrb[7].mxu0 }
 0x144   :  { %v321_v3 = vadd.f32 %v2078_v43, %v320_v2  ;;  %v483_v4 = vpack.c.bf16 %v454_v62, %v453_v63 }
 0x145   :  { %v456_v5 = vmax.f32 %v326_v1, 0.0 }
 0x146   :  { %v455_v6 = vmax.f32 %v321_v3, 0.0  ;;  %v1668_v7 = vpop.f32.mrb[8].mxu0  ;;  %1722 = vmatprep.mubr.bf16.mxu1 %v483_v4 }
 0x147   :  { %v336_v8 = vadd.f32 %v1668_v7, %v2078_v43  ;;  %v330_v9 = vpop.f32.mrb[9].mxu0 }
 0x148   :  { %v484_v10 = vpack.c.bf16 %v456_v5, %v455_v6  ;;  %v331_v11 = vadd.f32 %v2078_v43, %v330_v9 }
 0x149   :  { %v458_v12 = vmax.f32 %v336_v8, 0.0 }
 0x14a   :  { %v457_v13 = vmax.f32 %v331_v11, 0.0  ;;  %v1671_v14 = vpop.f32.mrb[10].mxu0  ;;  %1723 = vmatmul.mubr.bf16.vlgmr.msra.gmra.mrb[0].mxu1 %v484_v10 }
 0x14b   :  { %v346_v15 = vadd.f32 %v1671_v14, %v2078_v43  ;;  %v340_v16 = vpop.f32.mrb[11].mxu0 }
 0x14c   :  { %v485_v17 = vpack.c.bf16 %v458_v12, %v457_v13  ;;  %v341_v18 = vadd.f32 %v2078_v43, %v340_v16 }
 0x14d   :  { %v460_v19 = vmax.f32 %v346_v15, 0.0 }
 0x14e   :  { %v459_v20 = vmax.f32 %v341_v18, 0.0  ;;  %v1674_v21 = vpop.f32.mrb[12].mxu0  ;;  %1726 = vmatprep.mubr.bf16.mxu1 %v485_v17 }
 0x14f   :  { %v356_v22 = vadd.f32 %v1674_v21, %v2078_v43  ;;  %v350_v23 = vpop.f32.mrb[13].mxu0 }
 0x150   :  { %v486_v24 = vpack.c.bf16 %v460_v19, %v459_v20  ;;  %v351_v25 = vadd.f32 %v2078_v43, %v350_v23 }
 0x151   :  { %v462_v26 = vmax.f32 %v356_v22, 0.0 }
 0x152   :  { %v461_v27 = vmax.f32 %v351_v25, 0.0  ;;  %v1677_v28 = vpop.f32.mrb[14].mxu0  ;;  %1727 = vmatmul.mubr.bf16.gmra.mrb[4].mxu1 %v486_v24 }
 0x153   :  { %v366_v29 = vadd.f32 %v1677_v28, %v2078_v43  ;;  %v360_v30 = vpop.f32.mrb[15].mxu0 }
 0x154   :  { %v487_v31 = vpack.c.bf16 %v462_v26, %v461_v27  ;;  %v361_v32 = vadd.f32 %v2078_v43, %v360_v30 }
 0x155   :  { %v464_v33 = vmax.f32 %v366_v29, 0.0  ;;  %v1938_v29 = vmov 0.0|0.0  }
 0x156   :  { %v463_v34 = vmax.f32 %v361_v32, 0.0  ;;  %v1680_v35 = vpop.f32.mrb[16].mxu0  ;;  %1730 = vmatprep.mubr.bf16.mxu1 %v487_v31  ;;  %v1533_v30 = vcombine.low %v1938_v29, %v1938_v29  ;;  %v1534_v31 = vcombine.high %v1938_v29, %v1938_v29 }
 0x157   :  { %v376_v36 = vadd.f32 %v1680_v35, %v2078_v43  ;;  %v370_v37 = vpop.f32.mrb[17].mxu0 }
 0x158   :  { %v488_v38 = vpack.c.bf16 %v464_v33, %v463_v34  ;;  %v371_v39 = vadd.f32 %v2078_v43, %v370_v37  ;;  %1440 = vst [vmem:[#allocation11 + $0x10] sm:$0xf] %v1533_v30  ;;  %1441 = vst [vmem:[#allocation11 + $0x14] sm:$0xf] %v1534_v31 }
 0x159   :  { %v466_v40 = vmax.f32 %v376_v36, 0.0  ;;  %1442 = vst [vmem:[#allocation11 + $0x18] sm:$0xf] %v1533_v30  ;;  %1443 = vst [vmem:[#allocation11 + $0x1c] sm:$0xf] %v1534_v31 }
 0x15a   :  { %v465_v41 = vmax.f32 %v371_v39, 0.0  ;;  %v1683_v42 = vpop.f32.mrb[18].mxu0  ;;  %1731 = vmatmul.mubr.bf16.gmra.mrb[8].mxu1 %v488_v38  ;;  %1444 = vst [vmem:[#allocation11 + $0x20] sm:$0xf] %v1533_v30  ;;  %1445 = vst [vmem:[#allocation11 + $0x24] sm:$0xf] %v1534_v31 }
 0x15b   :  { %v386_v44 = vadd.f32 %v1683_v42, %v2078_v43  ;;  %v380_v45 = vpop.f32.mrb[19].mxu0  ;;  %1446 = vst [vmem:[#allocation11 + $0x28] sm:$0xf] %v1533_v30  ;;  %1447 = vst [vmem:[#allocation11 + $0x2c] sm:$0xf] %v1534_v31 }
 0x15c   :  { %v489_v46 = vpack.c.bf16 %v466_v40, %v465_v41  ;;  %v381_v47 = vadd.f32 %v2078_v43, %v380_v45  ;;  %1448 = vst [vmem:[#allocation11 + $0x30] sm:$0xf] %v1533_v30  ;;  %1449 = vst [vmem:[#allocation11 + $0x34] sm:$0xf] %v1534_v31  ;;  %v1520_v36 = vld [vmem:[#allocation10] ss:$0 sm:$0xff] }
 0x15d   :  { %v468_v48 = vmax.f32 %v386_v44, 0.0  ;;  %1450 = vst [vmem:[#allocation11 + $0x38] sm:$0xf] %v1533_v30  ;;  %1451 = vst [vmem:[#allocation11 + $0x3c] sm:$0xf] %v1534_v31 }
 0x15e   :  { %v467_v49 = vmax.f32 %v381_v47, 0.0  ;;  %v1686_v50 = vpop.f32.mrb[20].mxu0  ;;  %1734 = vmatprep.mubr.bf16.mxu1 %v489_v46  ;;  %1456 = vst [vmem:[#allocation11 + $0x50] sm:$0xf] %v1533_v30  ;;  %1457 = vst [vmem:[#allocation11 + $0x54] sm:$0xf] %v1534_v31 }
 0x15f   :  { %v396_v51 = vadd.f32 %v1686_v50, %v2078_v43  ;;  %v390_v52 = vpop.f32.mrb[21].mxu0  ;;  %1458 = vst [vmem:[#allocation11 + $0x58] sm:$0xf] %v1533_v30  ;;  %1459 = vst [vmem:[#allocation11 + $0x5c] sm:$0xf] %v1534_v31 }
 0x160   :  { %v490_v53 = vpack.c.bf16 %v468_v48, %v467_v49  ;;  %v391_v54 = vadd.f32 %v2078_v43, %v390_v52  ;;  %1460 = vst [vmem:[#allocation11 + $0x60] sm:$0xf] %v1533_v30  ;;  %1461 = vst [vmem:[#allocation11 + $0x64] sm:$0xf] %v1534_v31 }
 0x161   :  { %v470_v55 = vmax.f32 %v396_v51, 0.0  ;;  %1462 = vst [vmem:[#allocation11 + $0x68] sm:$0xf] %v1533_v30  ;;  %1463 = vst [vmem:[#allocation11 + $0x6c] sm:$0xf] %v1534_v31 }
 0x162   :  { %v469_v56 = vmax.f32 %v391_v54, 0.0  ;;  %v1689_v57 = vpop.f32.mrb[22].mxu0  ;;  %1735 = vmatmul.mubr.bf16.gmra.mrb[12].mxu1 %v490_v53  ;;  %1464 = vst [vmem:[#allocation11 + $0x70] sm:$0xf] %v1533_v30  ;;  %1465 = vst [vmem:[#allocation11 + $0x74] sm:$0xf] %v1534_v31 }
 0x163   :  { %v406_v58 = vadd.f32 %v1689_v57, %v2078_v43  ;;  %v400_v59 = vpop.f32.mrb[23].mxu0  ;;  %1466 = vst [vmem:[#allocation11 + $0x78] sm:$0xf] %v1533_v30  ;;  %1467 = vst [vmem:[#allocation11 + $0x7c] sm:$0xf] %v1534_v31 }
 0x164   :  { %v491_v60 = vpack.c.bf16 %v470_v55, %v469_v56  ;;  %v401_v61 = vadd.f32 %v2078_v43, %v400_v59 }
 0x165   :  { %v472_v62 = vmax.f32 %v406_v58, 0.0 }
 0x166   :  { %v471_v63 = vmax.f32 %v401_v61, 0.0  ;;  %v1692_v0 = vpop.f32.mrb[24].mxu0  ;;  %1738 = vmatprep.mubr.bf16.mxu1 %v491_v60 }
 0x167   :  { %v416_v1 = vadd.f32 %v1692_v0, %v2078_v43  ;;  %v410_v2 = vpop.f32.mrb[25].mxu0 }
 0x168   :  { %v492_v3 = vpack.c.bf16 %v472_v62, %v471_v63  ;;  %v411_v4 = vadd.f32 %v2078_v43, %v410_v2 }
 0x169   :  { %v474_v5 = vmax.f32 %v416_v1, 0.0 }
 0x16a   :  { %v473_v6 = vmax.f32 %v411_v4, 0.0  ;;  %v1695_v7 = vpop.f32.mrb[26].mxu0  ;;  %1739 = vmatmul.mubr.bf16.gmra.mrb[16].mxu1 %v492_v3 }
 0x16b   :  { %v426_v8 = vadd.f32 %v1695_v7, %v2078_v43  ;;  %v420_v9 = vpop.f32.mrb[27].mxu0 }
 0x16c   :  { %v493_v10 = vpack.c.bf16 %v474_v5, %v473_v6  ;;  %v421_v11 = vadd.f32 %v2078_v43, %v420_v9 }
 0x16d   :  { %v476_v12 = vmax.f32 %v426_v8, 0.0 }
 0x16e   :  { %v475_v13 = vmax.f32 %v421_v11, 0.0  ;;  %v1698_v14 = vpop.f32.mrb[28].mxu0  ;;  %1742 = vmatprep.mubr.bf16.mxu1 %v493_v10 }
 0x16f   :  { %v436_v15 = vadd.f32 %v1698_v14, %v2078_v43  ;;  %v430_v16 = vpop.f32.mrb[29].mxu0 }
 0x170   :  { %v494_v17 = vpack.c.bf16 %v476_v12, %v475_v13  ;;  %v431_v18 = vadd.f32 %v2078_v43, %v430_v16 }
 0x171   :  { %v478_v19 = vmax.f32 %v436_v15, 0.0 }
 0x172   :  { %v477_v20 = vmax.f32 %v431_v18, 0.0  ;;  %v1701_v21 = vpop.f32.mrb[30].mxu0  ;;  %1743 = vmatmul.mubr.bf16.gmra.mrb[20].mxu1 %v494_v17 }
 0x173   :  { %v446_v22 = vadd.f32 %v1701_v21, %v2078_v43  ;;  %v440_v23 = vpop.f32.mrb[31].mxu0 }
 0x174   :  { %v495_v24 = vpack.c.bf16 %v478_v19, %v477_v20  ;;  %v441_v25 = vadd.f32 %v2078_v43, %v440_v23  ;;  %v730_v43 = vlaneseq }
 0x175   :  { %v480_v26 = vmax.f32 %v446_v22, 0.0 }
 0x176   :  { %v479_v27 = vmax.f32 %v441_v25, 0.0  ;;  %1746 = vmatprep.mubr.bf16.mxu1 %v495_v24  ;;  %v731_v32 = vshrl.u32 %v730_v43, 7 }
 0x178   :  { %v496_v28 = vpack.c.bf16 %v480_v26, %v479_v27  ;;  %v734_v33 = vadd.s32 24, %v731_v32  ;;  %v750_v59 = vadd.s32 152, %v731_v32 }
 0x17a   :  { %1747 = vmatmul.mubr.bf16.gmra.mrb[24].mxu1 %v496_v28  ;;  %v821_v34 = vand.u32 127, %v734_v33  ;;  %v933_v61 = vand.u32 127, %v750_v59 }
 0x17c   :  { %vm1183_vm1 = vcmp.lt.s32.totalorder %v821_v34, 27  ;;  %vm1199_vm2 = vcmp.lt.s32.totalorder %v933_v61, 27 }
 0x215   :  { %v1720_v35 = vpop.f32.mrb[32].mxu0 }
 0x216   :  { %v602_v37 = vpop.f32.mrb[33].mxu0  ;;  %v611_v41 = vadd.f32 %v1720_v35, %v1520_v36 }
 0x217   :  { %v1721_v38 = vpop.f32.mrb[34].mxu0  ;;  %v603_v42 = vadd.f32 %v1520_v36, %v602_v37 }
 0x218   :  { %v614_v39 = vadd.f32 %v1721_v38, %v1520_v36  ;;  %v605_v40 = vpop.f32.mrb[35].mxu0 }
 0x219   :  { %v606_v44 = vadd.f32 %v1520_v36, %v605_v40 }
 0x21a   :  { %v1279_v45 = vsel %vm1183_vm1, %v614_v39, 0.0 }
 0x21b   :  { %v1577_v46 = vpack.c.bf16 %v1279_v45, %v611_v41  ;;  %v1572_v47 = vpack.c.bf16 %v606_v44, %v603_v42 }
 0x21d   :  { %1589 = vst [vmem:[#allocation11 + $0x8] sm:$0xff] %v1577_v46   ;;  %1573 = vst [vmem:[#allocation11] sm:$0xff] %v1572_v47   ;;  %v1724_v48 = vpop.f32.mrb[0].mxu1 }
 0x21e   :  { %v618_v49 = vpop.f32.mrb[1].mxu1 }
 0x21f   :  { %v1725_v50 = vpop.f32.mrb[2].mxu1 }
 0x220   :  { %v621_v51 = vpop.f32.mrb[3].mxu1 }
 0x225   :  { %v1728_v52 = vpop.f32.mrb[4].mxu1 }
 0x226   :  { %v634_v53 = vpop.f32.mrb[5].mxu1 }
 0x227   :  { %v1729_v54 = vpop.f32.mrb[6].mxu1 }
 0x228   :  { %v637_v55 = vpop.f32.mrb[7].mxu1 }
 0x22d   :  { %v1732_v56 = vpop.f32.mrb[8].mxu1 }
 0x22e   :  { %v650_v57 = vpop.f32.mrb[9].mxu1 }
 0x22f   :  { %v1733_v58 = vpop.f32.mrb[10].mxu1 }
 0x230   :  { %v653_v60 = vpop.f32.mrb[11].mxu1 }
 0x235   :  { %v1736_v62 = vpop.f32.mrb[12].mxu1 }
 0x236   :  { %v666_v63 = vpop.f32.mrb[13].mxu1  ;;  %v675_v3 = vadd.f32 %v1736_v62, %v1520_v36 }
 0x237   :  { %v1737_v0 = vpop.f32.mrb[14].mxu1  ;;  %v667_v4 = vadd.f32 %v1520_v36, %v666_v63 }
 0x238   :  { %v678_v1 = vadd.f32 %v1737_v0, %v1520_v36  ;;  %v669_v2 = vpop.f32.mrb[15].mxu1 }
 0x239   :  { %v670_v5 = vadd.f32 %v1520_v36, %v669_v2 }
 0x23a   :  { %v1295_v6 = vsel %vm1199_vm2, %v678_v1, 0.0 }
 0x23b   :  { %v1587_v7 = vpack.c.bf16 %v1295_v6, %v675_v3  ;;  %v1582_v8 = vpack.c.bf16 %v670_v5, %v667_v4 }
 0x23d   :  { %1591 = vst [vmem:[#allocation11 + $0x48] sm:$0xff] %v1587_v7   ;;  %1590 = vst [vmem:[#allocation11 + $0x40] sm:$0xff] %v1582_v8   ;;  %v1740_v9 = vpop.f32.mrb[16].mxu1 }
 0x23e   :  { %v682_v10 = vpop.f32.mrb[17].mxu1 }
 0x23f   :  { %1910 = shalt.err (!%p1907_p2)
}
 0x240   :  { %s1911_s11 = scalar_lea.hbm %s2132_s5, 2048 }
 0x241   :  { %p1912_p3 = scmp.ne.s32.totalorder %s2132_s5, %s1911_s11  ;;  %p1915_p4 = scmp.lt.u32.totalorder %s1911_s11, %s2132_s5 }
 0x243   :  { %p1917_p5 = pnand %p1915_p4, %p1912_p3 }
 0x245   :  { %1920 = shalt.err (!%p1917_p5)
}
 0x246   :  { %1479 = dma.vmem_to_hbm [thread:$0]  %s1474_s3, 2048, %s2132_s5, [#allocation4], %s1933_s1, %s1933_s1, %s1934_s17   ;;  %v1741_v11 = vpop.f32.mrb[18].mxu1 }
 0x247   :  { %v685_v12 = vpop.f32.mrb[19].mxu1 }
 0x248   :  { %v1744_v13 = vpop.f32.mrb[20].mxu1 }
 0x249   :  { %v698_v14 = vpop.f32.mrb[21].mxu1 }
 0x24a   :  { %v1745_v15 = vpop.f32.mrb[22].mxu1 }
 0x24b   :  { %v701_v16 = vpop.f32.mrb[23].mxu1 }
 0x24d   :  { %v1748_v17 = vpop.f32.mrb[24].mxu1 }
 0x24e   :  { %v714_v18 = vpop.f32.mrb[25].mxu1 }
 0x24f   :  { %v1749_v19 = vpop.f32.mrb[26].mxu1 }
 0x250   :  { %v717_v20 = vpop.f32.mrb[27].mxu1 }
 0x251   :  { %1927 = dma.done.wait [#allocation4], 2048  }
 0x252   :  { %1928 = vsyncadd [#allocation4], 4294965248 }
 0x253   :  { %1483 = vsyncpa [#allocation3], 1 }
 0x254   :  { %1484 = vsyncpa [#allocation6], 1 }
 0x255   :  { %1485 = vsyncpa [#allocation9], 1 }
 0x256   :  { %1486 = vsyncpa [#allocation4], 1 }

</bundles_post_ra>
